<compile_context>
chip_gen: v7x
topology: tpu7x:2x2x1
jax: 0.10.0
libtpu: 0.0.40
codegen_flags: <defaults>
</compile_context>

<pallas_src>
import functools

import jax
import jax.numpy as jnp
from jax.experimental import pallas as pl
from jax.experimental.pallas import tpu as pltpu

LANE = 128
# ~2 MiB per input tile per pipeline buffer -> <= 8 MiB of double-buffered
# input VMEM (2 inputs x 2 buffers), well inside the 32 MiB limit requested.
MAX_TILE_BYTES_PER_INPUT = 2 * 1024 * 1024


def _rmse_partial_kernel(x_ref, y_ref, o_ref, *, block_rows, blocks_per_chunk,
                         valid_rows, need_mask):
    c = pl.program_id(0)   # chunk axis ("parallel")
    s = pl.program_id(1)   # sequential reduction axis within the chunk

    # o_ref's block index only depends on c, so it stays resident across the
    # whole s axis: accumulate into it directly (no scratch, no epilogue copy).
    @pl.when(s == 0)
    def _():
        o_ref[...] = jnp.zeros_like(o_ref)

    d = x_ref[...].astype(jnp.float32) - y_ref[...].astype(jnp.float32)
    sq = d * d

    if need_mask:
        # Ragged tail: rows at/after `valid_rows` hold Pallas boundary padding
        # (or belong to a phantom step of an odd chunk split); zero them out.
        row0 = (c * blocks_per_chunk + s) * block_rows
        row_ids = row0 + jax.lax.broadcasted_iota(
            jnp.int32, (block_rows, LANE), 0)
        sq = jnp.where(row_ids < valid_rows, sq, 0.0)

    # Fold the (block_rows, 128) tile onto the resident (8, 128) accumulator
    # with pure VPU elementwise adds (no per-step cross-lane reduction).
    o_ref[...] += jnp.sum(sq.reshape(block_rows // 8, 8, LANE), axis=0)


def rmse_loss(x, y):
    """sqrt(mean((x - y)^2)) over all elements (nn.MSELoss + torch.sqrt)."""
    assert x.shape == y.shape, "RMSELoss expects matching shapes"
    n_total = int(x.size)
    assert n_total > 0, "RMSELoss needs at least one element"

    itemsize = jnp.dtype(x.dtype).itemsize
    packing = max(1, 4 // itemsize)        # f32 -> 1, bf16 -> 2, int8/fp8 -> 4
    sub_mult = 8 * packing                 # packed-sublane row multiple

    # Flatten in native dtype (free).  Only when the element count is not a
    # multiple of the 128-lane width do we pad to the next lane boundary;
    # zero pads on both x and y contribute 0 to the squared-error sum.
    xf = x.reshape(-1)
    yf = y.reshape(-1)
    rem = n_total % LANE
    if rem:
        # TODO(synk): for n_total % 128 != 0 this still makes one padded copy
        # of each input; a fully copy-free path needs a 1-D manual-DMA kernel.
        pad = LANE - rem
        xf = jnp.pad(xf, (0, pad))
        yf = jnp.pad(yf, (0, pad))
    rows = xf.size // LANE
    x2 = xf.reshape(rows, LANE)
    y2 = yf.reshape(rows, LANE)

    # Largest tile that keeps per-input-per-buffer VMEM at ~2 MiB, rounded to
    # the packed-sublane multiple of the input dtype and capped at the data.
    max_block_rows = max(sub_mult, MAX_TILE_BYTES_PER_INPUT // (LANE * itemsize))
    block_rows = min(max_block_rows,
                     ((rows + sub_mult - 1) // sub_mult) * sub_mult)
    num_blocks = pl.cdiv(rows, block_rows)

    # Two chunks whenever there is more than one block so v7x can shard the
    # leading axis across its two TensorCores (regardless of parity: an odd
    # block count gets a phantom step that is masked to zero in-kernel and
    # whose read is clamped in-bounds by the index_map).  Harmless on
    # single-core v5e/v6e.
    num_chunks = 2 if num_blocks >= 2 else 1
    blocks_per_chunk = pl.cdiv(num_blocks, num_chunks)
    need_mask = (rows % block_rows != 0) or \
                (num_chunks * blocks_per_chunk != num_blocks)

    def in_index_map(c, s):
        # Clamp so the phantom step of an odd split re-reads the last real
        # block (its contribution is masked to zero inside the kernel).
        blk = jnp.minimum(c * blocks_per_chunk + s, num_blocks - 1)
        return (blk, 0)

    kernel = functools.partial(
        _rmse_partial_kernel,
        block_rows=block_rows,
        blocks_per_chunk=blocks_per_chunk,
        valid_rows=rows,
        need_mask=need_mask,
    )

    # TODO(synk): on v7x, pltpu.CORE_PARALLEL on the chunk axis (verified in a
    # trace) may be needed to guarantee both TensorCores run; "parallel" is
    # kept here as the portable megacore annotation safe on v5e/v6e.
    partials = pl.pallas_call(
        kernel,
        out_shape=jax.ShapeDtypeStruct((num_chunks * 8, LANE), jnp.float32),
        grid_spec=pltpu.PrefetchScalarGridSpec(
            num_scalar_prefetch=0,
            grid=(num_chunks, blocks_per_chunk),
            in_specs=[
                pl.BlockSpec((block_rows, LANE), in_index_map),
                pl.BlockSpec((block_rows, LANE), in_index_map),
            ],
            out_specs=pl.BlockSpec((8, LANE), lambda c, s: (c, 0)),
        ),
        compiler_params=pltpu.CompilerParams(
            dimension_semantics=("parallel", "arbitrary"),
            vmem_limit_bytes=32 * 1024 * 1024,
        ),
    )(x2, y2)

    # Single tiny cross-lane reduce + sqrt over a (num_chunks*8, 128) slab.
    return jnp.sqrt(jnp.sum(partials) / jnp.float32(n_total))


if __name__ == "__main__":
    key = jax.random.PRNGKey(0)
    kx, ky = jax.random.split(key)
    # Small NCHW-style inputs: batch=2, channels=4, spatial=16x16.
    x = jax.random.normal(kx, (2, 4, 16, 16), dtype=jnp.float32)
    y = jax.random.normal(ky, (2, 4, 16, 16), dtype=jnp.float32)

    loss = rmse_loss(x, y)
    jax.block_until_ready(loss)

    ref = jnp.sqrt(jnp.mean((x - y) ** 2))
    assert jnp.allclose(loss, ref, rtol=1e-5, atol=1e-6), (loss, ref)
    print("KERNEL_OK")
</pallas_src>

<mosaic_0001>
module attributes {stable_mosaic.version = 11 : i64} {
  func.func @_rmse_partial_kernel(%arg0: i32, %arg1: i32, %arg2: memref<16x128xf32, #tpu.memory_space<vmem>>, %arg3: memref<16x128xf32, #tpu.memory_space<vmem>>, %arg4: memref<8x128xf32, #tpu.memory_space<vmem>>) attributes {dimension_semantics = [#tpu.dimension_semantics<parallel>, #tpu.dimension_semantics<arbitrary>], iteration_bounds = array<i64: 1, 1>, scalar_prefetch = 0 : i64, scratch_operands = 0 : i64, tpu.core_type = #tpu.core_type<tc>, window_params = [{transform_indices = @transform_0, window_bounds = array<i64: 16, 128>}, {transform_indices = @transform_1, window_bounds = array<i64: 16, 128>}, {transform_indices = @transform_2, window_bounds = array<i64: 8, 128>}]} {
    %c0_i32 = arith.constant 0 : i32
    %0 = arith.cmpi eq, %arg1, %c0_i32 : i32
    %1 = arith.extui %0 : i1 to i32
    %c0_i32_0 = arith.constant 0 : i32
    %2 = arith.cmpi ne, %1, %c0_i32_0 : i32
    scf.if %2 {
      %cst_8 = arith.constant 0.000000e+00 : f32
      %12 = vector.broadcast %cst_8 : f32 to vector<8x128xf32>
      %c0_9 = arith.constant 0 : index
      %c0_10 = arith.constant 0 : index
      %13 = vector.load %arg4[%c0_9, %c0_10] : memref<8x128xf32, #tpu.memory_space<vmem>>, vector<8x128xf32>
      tpu.vector_store %arg4[%c0_9, %c0_10], %12 {strides = array<i32>} : memref<8x128xf32, #tpu.memory_space<vmem>>, vector<8x128xf32>,
    } else {
    }
    %c0 = arith.constant 0 : index
    %c0_1 = arith.constant 0 : index
    %3 = vector.load %arg2[%c0, %c0_1] : memref<16x128xf32, #tpu.memory_space<vmem>>, vector<16x128xf32>
    %c0_2 = arith.constant 0 : index
    %c0_3 = arith.constant 0 : index
    %4 = vector.load %arg3[%c0_2, %c0_3] : memref<16x128xf32, #tpu.memory_space<vmem>>, vector<16x128xf32>
    %5 = arith.subf %3, %4 : vector<16x128xf32>
    %6 = arith.mulf %5, %5 : vector<16x128xf32>
    %c0_4 = arith.constant 0 : index
    %c0_5 = arith.constant 0 : index
    %7 = vector.load %arg4[%c0_4, %c0_5] : memref<8x128xf32, #tpu.memory_space<vmem>>, vector<8x128xf32>
    %8 = vector.shape_cast %6 : vector<16x128xf32> to vector<2x8x128xf32>
    %cst = arith.constant dense<0.000000e+00> : vector<8x128xf32>
    %9 = vector.multi_reduction <add>, %8, %cst [0] : vector<2x8x128xf32> to vector<8x128xf32>
    %10 = arith.addf %7, %9 : vector<8x128xf32>
    %c0_6 = arith.constant 0 : index
    %c0_7 = arith.constant 0 : index
    %11 = vector.load %arg4[%c0_6, %c0_7] : memref<8x128xf32, #tpu.memory_space<vmem>>, vector<8x128xf32>
    tpu.vector_store %arg4[%c0_6, %c0_7], %10 {strides = array<i32>} : memref<8x128xf32, #tpu.memory_space<vmem>>, vector<8x128xf32>,
    return
  }
  func.func @transform_0(%arg0: i32, %arg1: i32) -> (i32, i32) {
    %c1_i32 = arith.constant 1 : i32
    %0 = arith.muli %arg0, %c1_i32 : i32
    %1 = arith.addi %0, %arg1 : i32
    %c0_i32 = arith.constant 0 : i32
    %2 = arith.minsi %1, %c0_i32 : i32
    %c0_i32_0 = arith.constant 0 : i32
    %c0_i32_1 = arith.constant 0 : i32
    return %2, %c0_i32_0 : i32, i32
  }
  func.func @transform_1(%arg0: i32, %arg1: i32) -> (i32, i32) {
    %c1_i32 = arith.constant 1 : i32
    %0 = arith.muli %arg0, %c1_i32 : i32
    %1 = arith.addi %0, %arg1 : i32
    %c0_i32 = arith.constant 0 : i32
    %2 = arith.minsi %1, %c0_i32 : i32
    %c0_i32_0 = arith.constant 0 : i32
    %c0_i32_1 = arith.constant 0 : i32
    return %2, %c0_i32_0 : i32, i32
  }
  func.func @transform_2(%arg0: i32, %arg1: i32) -> (i32, i32) {
    %c0_i32 = arith.constant 0 : i32
    %c0_i32_0 = arith.constant 0 : i32
    return %arg0, %c0_i32 : i32, i32
  }
}

</mosaic_0001>

<bundles_post_ra>
// kernel: tpu_custom_call.1
= control target key start
LH: loop header
LB: loop body
LE: loop exit
PB: predicated region body
PF: predicated region fallthrough
CT: control target
= control target key end

     0   :  { %7 = vsyncpa [#allocation3], 0  ;;  %s231_s0 = inlined_call_operand.hbm [shape: f32[16,128], index: 0, kind: input, shape index: {}]   ;;  %s232_s1 = inlined_call_operand.hbm [shape: f32[16,128], index: 1, kind: input, shape index: {}]   ;;  %s233_s2 = inlined_call_operand.hbm [shape: f32[8,128], index: 2, kind: output, shape index: {}]  }
   0x1   :  { %8 = vsyncpa [#allocation6], 0 }
   0x2   :  { %9 = vsyncpa [#allocation4], 0  ;;  %s175_s9 = smov [#allocation2]   ;;  %s103_s13 = scalar_lea.hbm %s231_s0, 256 }
   0x3   :  { %s21_s10 = sshll.u32 %s175_s9, 4  ;;  %p104_p0 = scmp.ne.s32.totalorder %s231_s0, %s103_s13  ;;  %s22_s10 = int_to_ptr.vmem [resolvable:$true] %s21_s10 }
   0x4   :  { %p107_p1 = scmp.lt.u32.totalorder %s103_s13, %s231_s0 }
   0x6   :  { %p109_p2 = pnand %p107_p1, %p104_p0 }
   0x8   :  { %112 = shalt.err (!%p109_p2)
}
   0x9   :  { %s113_s18 = scalar_lea.vmem %s22_s10, 256  ;;  %p118_p4 = scmp.lt.s32.totalorder %s22_s10, %s22_s10 }
   0xa   :  { %p114_p3 = scmp.ne.s32.totalorder %s22_s10, %s113_s18  ;;  %p119_p5 = scmp.lt.s32.totalorder %s113_s18, %s113_s18 }
   0xc   :  { %p120_p6 = por %p119_p5, %p118_p4 }
   0xe   :  { %p121_p7 = pnand %p120_p6, %p114_p3 }
  0x10   :  { %124 = shalt.err (!%p121_p7)
}
  0x11   :  { %s176_s19 = smov 128   ;;  %s177_s20 = smov 8  }
  0x12   :  { %27 = dma.hbm_to_vmem [thread:$0]  %s231_s0, 256, %s22_s10, [#allocation3], %s176_s19, %s176_s19, %s177_s20  }
  0x13   :  { %s178_s23 = smov [#allocation5]   ;;  %s125_s27 = scalar_lea.hbm %s232_s1, 256 }
  0x14   :  { %s39_s24 = sshll.u32 %s178_s23, 4  ;;  %p126_p8 = scmp.ne.s32.totalorder %s232_s1, %s125_s27  ;;  %s40_s24 = int_to_ptr.vmem [resolvable:$true] %s39_s24 }
  0x15   :  { %p129_p9 = scmp.lt.u32.totalorder %s125_s27, %s232_s1 }
  0x17   :  { %p131_p10 = pnand %p129_p9, %p126_p8 }
  0x19   :  { %134 = shalt.err (!%p131_p10)
}
  0x1a   :  { %s135_s4 = scalar_lea.vmem %s40_s24, 256  ;;  %p140_p12 = scmp.lt.s32.totalorder %s40_s24, %s40_s24 }
  0x1b   :  { %p136_p11 = scmp.ne.s32.totalorder %s40_s24, %s135_s4  ;;  %p141_p13 = scmp.lt.s32.totalorder %s135_s4, %s135_s4 }
  0x1d   :  { %p142_p0 = por %p141_p13, %p140_p12 }
  0x1f   :  { %p143_p1 = pnand %p142_p0, %p136_p11 }
  0x21   :  { %146 = shalt.err (!%p143_p1)
}
  0x22   :  { %45 = dma.hbm_to_vmem [thread:$0]  %s232_s1, 256, %s40_s24, [#allocation6], %s176_s19, %s176_s19, %s177_s20  }
  0x23   :  { %169 = dma.done.wait [#allocation3], 256  }
  0x24   :  { %170 = vsyncadd [#allocation3], 4294967040 }
  0x25   :  { %171 = dma.done.wait [#allocation6], 256  }
  0x26   :  { %172 = vsyncadd [#allocation6], 4294967040  ;;  %v65_v0 = vld [vmem:[#allocation2] sm:$0xff]  ;;  %v66_v1 = vld [vmem:[#allocation2 + $0x8] sm:$0xff]  ;;  %s179_s6 = smov [#allocation7]  }
  0x27   :  { %v67_v2 = vld [vmem:[#allocation5] sm:$0xff]  ;;  %v68_v3 = vld [vmem:[#allocation5 + $0x8] sm:$0xff]  ;;  %s83_s7 = sshll.u32 %s179_s6, 4  ;;  %s84_s7 = int_to_ptr.vmem [resolvable:$true] %s83_s7 }
  0x28   :  { %v69_v4 = vsub.f32 %v65_v0, %v67_v2  ;;  %v70_v5 = vsub.f32 %v66_v1, %v68_v3  ;;  %s147_s8 = scalar_lea.vmem %s84_s7, 128  ;;  %p152_p3 = scmp.lt.s32.totalorder %s84_s7, %s84_s7 }
  0x29   :  { %p148_p2 = scmp.ne.s32.totalorder %s84_s7, %s147_s8  ;;  %p153_p4 = scmp.lt.s32.totalorder %s147_s8, %s147_s8 }
  0x2a   :  { %v71_v6 = vmul.f32 %v69_v4, %v69_v4  ;;  %v72_v7 = vmul.f32 %v70_v5, %v70_v5 }
  0x2b   :  { %p154_p5 = por %p153_p4, %p152_p3 }
  0x2c   :  { %v74_v8 = vadd.f32 %v72_v7, %v71_v6 }
  0x2d   :  { %p155_p6 = pnand %p154_p5, %p148_p2 }
  0x2e   :  { %76 = vst [vmem:[#allocation7] sm:$0xff] %v74_v8 }
  0x2f   :  { %158 = shalt.err (!%p155_p6)
}
  0x30   :  { %s159_s10 = scalar_lea.hbm %s233_s2, 128 }
  0x31   :  { %p160_p7 = scmp.ne.s32.totalorder %s233_s2, %s159_s10  ;;  %p163_p8 = scmp.lt.u32.totalorder %s159_s10, %s233_s2 }
  0x33   :  { %p165_p9 = pnand %p163_p8, %p160_p7 }
  0x35   :  { %168 = shalt.err (!%p165_p9)
}
  0x36   :  { %86 = dma.vmem_to_hbm [thread:$0]  %s84_s7, 128, %s233_s2, [#allocation4]  }
  0x37   :  { %173 = dma.done.wait [#allocation4], 128  }
  0x38   :  { %174 = vsyncadd [#allocation4], 4294967168 }
  0x39   :  { %90 = vsyncpa [#allocation3], 1 }
  0x3a   :  { %91 = vsyncpa [#allocation6], 1 }
  0x3b   :  { %92 = vsyncpa [#allocation4], 1 }

</bundles_post_ra>
